<compile_context>
chip_gen: v7x
topology: tpu7x:2x2x1
jax: 0.10.0
libtpu: 0.0.40
codegen_flags: <defaults>
</compile_context>

<pallas_src>
import functools

import jax
import jax.numpy as jnp
from jax import lax
from jax.experimental import pallas as pl
from jax.experimental.pallas import tpu as pltpu


def skconv_kernel(p_ref, wt_ref, scale_ref, shift_ref, lw_ref, lb_ref, mt_ref,
                  out_ref, att_ref, *, Kn, C_out):
    """One grid step = one batch element.

    p_ref     : (1, KKC_pad, HW)   im2col patches (lane-dense on HW), f32 or bf16
    wt_ref    : (Kn*C_out, KKC_pad) concatenated, spatially zero-padded conv weights (transposed)
    scale_ref : (Kn*C_out, 1)       folded BN scale
    shift_ref : (Kn*C_out, 1)       folded BN shift (+ conv bias)
    lw_ref    : (C_half, C_out)     squeeze Linear weight (torch layout)
    lb_ref    : (C_half, 1)         squeeze Linear bias
    mt_ref    : (Kn*C_out, C_half)  per-path excitation matrices, transposed + concatenated
    out_ref   : (1, C_out, HW)      result (channel-major -> reshapes to NCHW in glue)
    att_ref   : (1, Kn*C_out, 1)    softmax attention weights (mean over C_out taken in glue)
    """
    # ---- all Kn conv paths in a single lane-dense MXU dot + folded BN + ReLU ----
    acc = jnp.dot(wt_ref[...], p_ref[0],
                  preferred_element_type=jnp.float32)            # (Kn*C_out, HW), f32
    y = jnp.maximum(acc * scale_ref[...] + shift_ref[...], 0.0)   # f32 epilogue

    # ---- fuse + global average pool (fully local: one batch element per grid step) ----
    fuse = y[0:C_out, :]
    for pi in range(1, Kn):
        fuse = fuse + y[pi * C_out:(pi + 1) * C_out, :]
    z = jnp.mean(fuse, axis=-1, keepdims=True)                    # (C_out, 1)

    # ---- squeeze Linear + per-path excitation (tiny column-vector matmuls) ----
    s = jnp.dot(lw_ref[...], z, preferred_element_type=jnp.float32) + lb_ref[...]   # (C_half, 1)
    f = jnp.dot(mt_ref[...], s, preferred_element_type=jnp.float32)                 # (Kn*C_out, 1)

    # ---- softmax across the Kn paths (per output channel), EUP reciprocal ----
    fs = [f[pi * C_out:(pi + 1) * C_out, :] for pi in range(Kn)]
    mx = fs[0]
    for fp in fs[1:]:
        mx = jnp.maximum(mx, fp)
    es = [jnp.exp(fp - mx) for fp in fs]
    den = es[0]
    for ep in es[1:]:
        den = den + ep
    inv = pl.reciprocal(den, approx=True)                         # EUP slot, ~free
    atts = [ep * inv for ep in es]                                 # each (C_out, 1)

    att_ref[0] = jnp.concatenate(atts, axis=0)                     # (Kn*C_out, 1)

    # ---- attention-weighted combination, accumulated in registers, one store ----
    res = atts[0] * y[0:C_out, :]
    for pi in range(1, Kn):
        res = res + atts[pi] * y[pi * C_out:(pi + 1) * C_out, :]
    out_ref[0] = res


def skconv_forward(x_nchw, params, kernel_list, compute_dtype=jnp.float32):
    """Glue: im2col + weight packing + pallas_call. Returns (result NCHW, attFactor (B, Kn))."""
    B, C_in, H, W = x_nchw.shape
    Kn = len(kernel_list)
    Kmax = max(kernel_list)
    assert all(k % 2 == 1 for k in kernel_list), "only odd kernel sizes supported"
    pad = (Kmax - 1) // 2
    C_out = params["conv_w"][0].shape[-1]
    C_half = C_out // 2
    HW = H * W
    KnC = Kn * C_out

    # ---- im2col in glue (lane-dense: spatial on lanes, taps*channels on sublanes) ----
    x = jnp.transpose(x_nchw, (0, 2, 3, 1)).astype(jnp.float32)            # NCHW -> NHWC
    xpad = jnp.pad(x, ((0, 0), (pad, pad), (pad, pad), (0, 0)))
    taps = jnp.stack([xpad[:, kh:kh + H, kw:kw + W, :]
                      for kh in range(Kmax) for kw in range(Kmax)], axis=1)  # (B, K*K, H, W, Cin)
    patches = jnp.transpose(taps, (0, 1, 4, 2, 3)).reshape(B, Kmax * Kmax * C_in, HW)

    KKC = Kmax * Kmax * C_in
    KKC_pad = ((KKC + 7) // 8) * 8
    if KKC_pad != KKC:
        patches = jnp.pad(patches, ((0, 0), (0, KKC_pad - KKC), (0, 0)))

    # ---- pack conv weights: zero-pad each k x k kernel to Kmax x Kmax, concat paths ----
    wlist = []
    for i, k in enumerate(kernel_list):
        d = (Kmax - k) // 2
        wlist.append(jnp.pad(params["conv_w"][i], ((d, d), (d, d), (0, 0), (0, 0))))
    w2d = jnp.concatenate(wlist, axis=-1).reshape(KKC, KnC)                 # rows ordered (kh,kw,c)
    if KKC_pad != KKC:
        w2d = jnp.pad(w2d, ((0, KKC_pad - KKC), (0, 0)))
    wt = jnp.transpose(w2d)                                                 # (Kn*C_out, KKC_pad)

    scale = jnp.concatenate([params["bn_scale"][i] for i in range(Kn)]).reshape(KnC, 1)
    shift = jnp.concatenate([params["bn_shift"][i] for i in range(Kn)]).reshape(KnC, 1)
    lin_w = params["lin_w"]                                                 # (C_half, C_out)
    lin_b = params["lin_b"].reshape(C_half, 1)
    mats_t = jnp.concatenate([m.T for m in params["mats"]], axis=0)         # (Kn*C_out, C_half)

    # bf16 MXU streams (recommended on v6e/v7x); accumulation stays f32 inside the kernel.
    patches = patches.astype(compute_dtype)
    wt = wt.astype(compute_dtype)

    kern = functools.partial(skconv_kernel, Kn=Kn, C_out=C_out)

    # VMEM budget hint (double-buffered streaming tiles + resident weights + y intermediate).
    itemsize = jnp.dtype(compute_dtype).itemsize
    blk_bytes = (KKC_pad * HW * itemsize            # im2col tile
                 + C_out * HW * 4                   # output tile
                 + KnC * KKC_pad * itemsize         # packed weights
                 + KnC * HW * 4                     # per-path activations (f32)
                 + (4 * KnC + C_half * (C_out + 1) + KnC * C_half) * 4)
    vmem_limit = int(min(max(4 * blk_bytes + (2 << 20), 8 << 20), 64 << 20))

    grid_spec = pltpu.PrefetchScalarGridSpec(
        num_scalar_prefetch=0,
        grid=(B,),
        in_specs=[
            pl.BlockSpec((1, KKC_pad, HW), lambda b: (b, 0, 0)),   # im2col patches (per batch)
            pl.BlockSpec((KnC, KKC_pad), lambda b: (0, 0)),        # packed conv weights
            pl.BlockSpec((KnC, 1), lambda b: (0, 0)),              # BN scale
            pl.BlockSpec((KnC, 1), lambda b: (0, 0)),              # BN shift
            pl.BlockSpec((C_half, C_out), lambda b: (0, 0)),       # linear weight
            pl.BlockSpec((C_half, 1), lambda b: (0, 0)),           # linear bias
            pl.BlockSpec((KnC, C_half), lambda b: (0, 0)),         # excitation matrices
        ],
        out_specs=(
            pl.BlockSpec((1, C_out, HW), lambda b: (b, 0, 0)),     # lane-dense result
            pl.BlockSpec((1, KnC, 1), lambda b: (b, 0, 0)),        # softmax attention weights
        ),
    )

    out_t, att_col = pl.pallas_call(
        kern,
        out_shape=(jax.ShapeDtypeStruct((B, C_out, HW), jnp.float32),
                   jax.ShapeDtypeStruct((B, KnC, 1), jnp.float32)),
        grid_spec=grid_spec,
        compiler_params=pltpu.CompilerParams(
            dimension_semantics=("parallel",),      # megacore sharding over batch on v7x
            vmem_limit_bytes=vmem_limit),
    )(patches, wt, scale, shift, lin_w, lin_b, mats_t)

    out_nchw = out_t.reshape(B, C_out, H, W)                       # channel-major -> NCHW directly
    att = jnp.mean(att_col.reshape(B, Kn, C_out), axis=2)          # attFactor, like torch.mean(dim=2)
    return out_nchw, att


def init_params(key, C_in, C_out, kernel_list):
    """Deterministic synthetic parameter init (shapes from SKConvBlock.__init__)."""
    eps = 1e-5
    n = len(kernel_list)
    keys = jax.random.split(key, 4 * n + 2)
    conv_w, bn_scale, bn_shift = [], [], []
    ki = 0
    for k in kernel_list:
        w = 0.2 * jax.random.normal(keys[ki], (k, k, C_in, C_out), jnp.float32); ki += 1  # HWIO
        b = 0.1 * jax.random.normal(keys[ki], (C_out,), jnp.float32); ki += 1             # conv bias
        gamma = 1.0 + 0.1 * jax.random.normal(keys[ki], (C_out,), jnp.float32); ki += 1   # BN weight
        beta = 0.1 * jax.random.normal(keys[ki], (C_out,), jnp.float32); ki += 1          # BN bias
        s = gamma / jnp.sqrt(1.0 + eps)         # fold conv bias + inference BN (mean=0, var=1)
        conv_w.append(w)
        bn_scale.append(s)
        bn_shift.append(b * s + beta)
    lin_w = 0.2 * jax.random.normal(keys[ki], (C_out // 2, C_out), jnp.float32); ki += 1  # torch layout
    lin_b = 0.1 * jax.random.normal(keys[ki], (C_out // 2,), jnp.float32)
    mkeys = jax.random.split(jax.random.fold_in(key, 123), n)
    mats = [jax.random.normal(mkeys[i], (C_out // 2, C_out), jnp.float32) for i in range(n)]
    return dict(conv_w=conv_w, bn_scale=bn_scale, bn_shift=bn_shift,
                lin_w=lin_w, lin_b=lin_b, mats=mats)


def reference_forward(x_nchw, params, kernel_list):
    """Pure-JAX reference mirroring the PyTorch forward (for correctness check)."""
    x = jnp.transpose(x_nchw, (0, 2, 3, 1)).astype(jnp.float32)
    ys = []
    for i, _ in enumerate(kernel_list):
        conv = lax.conv_general_dilated(
            x, params["conv_w"][i], window_strides=(1, 1), padding="SAME",
            dimension_numbers=("NHWC", "HWIO", "NHWC"))
        y = jnp.maximum(conv * params["bn_scale"][i].reshape(1, 1, 1, -1)
                        + params["bn_shift"][i].reshape(1, 1, 1, -1), 0.0)
        ys.append(y)
    fuse = ys[0]
    for y in ys[1:]:
        fuse = fuse + y
    z = jnp.mean(fuse, axis=(1, 2))
    s = z @ params["lin_w"].T + params["lin_b"]
    f = jnp.stack([s @ m for m in params["mats"]], axis=1)          # (B, Kn, C_out)
    a = jax.nn.softmax(f, axis=1)
    res = 0
    for i in range(len(kernel_list)):
        res = res + a[:, i][:, None, None, :] * ys[i]
    att = jnp.mean(a, axis=2)
    return jnp.transpose(res, (0, 3, 1, 2)), att


if __name__ == "__main__":
    key = jax.random.PRNGKey(0)
    kernel_list = [3, 5]
    B, C_in, H, W = 2, 4, 16, 16
    C_out = 8

    kx, kp = jax.random.split(key)
    x = jax.random.normal(kx, (B, C_in, H, W), jnp.float32)        # NCHW, like PyTorch
    params = init_params(kp, C_in, C_out, kernel_list)

    out, att = skconv_forward(x, params, kernel_list)               # f32 MXU path
    jax.block_until_ready((out, att))

    ref_out, ref_att = reference_forward(x, params, kernel_list)
    assert out.shape == (B, C_out, H, W)
    assert att.shape == (B, len(kernel_list))
    # Tolerance covers the approximate EUP reciprocal (pl.reciprocal(approx=True)) in the softmax.
    assert jnp.allclose(out, ref_out, atol=5e-3, rtol=1e-2), "result mismatch vs reference"
    assert jnp.allclose(att, ref_att, atol=1e-2, rtol=1e-2), "attFactor mismatch vs reference"

    # bf16 MXU streams (v6e/v7x recommendation): halves HBM/VMEM traffic; f32 accumulation.
    out_bf, att_bf = skconv_forward(x, params, kernel_list, compute_dtype=jnp.bfloat16)
    jax.block_until_ready((out_bf, att_bf))
    assert jnp.allclose(out_bf, ref_out, atol=1e-1, rtol=1e-1), "bf16 path mismatch vs reference"

    print("KERNEL_OK")
</pallas_src>

<mosaic_0001>
module attributes {stable_mosaic.version = 11 : i64} {
  func.func @skconv_kernel(%arg0: i32, %arg1: memref<1x104x256xf32, #tpu.memory_space<vmem>>, %arg2: memref<16x104xf32, #tpu.memory_space<vmem>>, %arg3: memref<16x1xf32, #tpu.memory_space<vmem>>, %arg4: memref<16x1xf32, #tpu.memory_space<vmem>>, %arg5: memref<4x8xf32, #tpu.memory_space<vmem>>, %arg6: memref<4x1xf32, #tpu.memory_space<vmem>>, %arg7: memref<16x4xf32, #tpu.memory_space<vmem>>, %arg8: memref<1x8x256xf32, #tpu.memory_space<vmem>>, %arg9: memref<1x16x1xf32, #tpu.memory_space<vmem>>) attributes {dimension_semantics = [#tpu.dimension_semantics<parallel>], iteration_bounds = array<i64: 2>, scalar_prefetch = 0 : i64, scratch_operands = 0 : i64, tpu.core_type = #tpu.core_type<tc>, window_params = [{transform_indices = @transform_0, window_bounds = array<i64: 1, 104, 256>}, {pipeline_mode = #tpu.pipeline_mode<synchronous>, transform_indices = @transform_1, window_bounds = array<i64: 16, 104>}, {pipeline_mode = #tpu.pipeline_mode<synchronous>, transform_indices = @transform_2, window_bounds = array<i64: 16, 1>}, {pipeline_mode = #tpu.pipeline_mode<synchronous>, transform_indices = @transform_3, window_bounds = array<i64: 16, 1>}, {pipeline_mode = #tpu.pipeline_mode<synchronous>, transform_indices = @transform_4, window_bounds = array<i64: 4, 8>}, {pipeline_mode = #tpu.pipeline_mode<synchronous>, transform_indices = @transform_5, window_bounds = array<i64: 4, 1>}, {pipeline_mode = #tpu.pipeline_mode<synchronous>, transform_indices = @transform_6, window_bounds = array<i64: 16, 4>}, {transform_indices = @transform_7, window_bounds = array<i64: 1, 8, 256>}, {transform_indices = @transform_8, window_bounds = array<i64: 1, 16, 1>}]} {
    %c0 = arith.constant 0 : index
    %c0_0 = arith.constant 0 : index
    %0 = vector.load %arg2[%c0, %c0_0] : memref<16x104xf32, #tpu.memory_space<vmem>>, vector<16x104xf32>
    %c0_1 = arith.constant 0 : index
    %c0_2 = arith.constant 0 : index
    %c0_3 = arith.constant 0 : index
    %1 = vector.load %arg1[%c0_1, %c0_2, %c0_3] : memref<1x104x256xf32, #tpu.memory_space<vmem>>, vector<1x104x256xf32>
    %2 = vector.shape_cast %1 : vector<1x104x256xf32> to vector<104x256xf32>
    %cst = arith.constant dense<0.000000e+00> : vector<16x256xf32>
    %3 = tpu.matmul %0, %2, %cst {dimension_numbers = #tpu.dot_dimension_numbers<[1], [0], [0], [1], [0, 0, 1, 1], [], []>} : vector<16x104xf32>, vector<104x256xf32>, vector<16x256xf32> -> vector<16x256xf32>
    %c0_4 = arith.constant 0 : index
    %c0_5 = arith.constant 0 : index
    %4 = vector.load %arg3[%c0_4, %c0_5] : memref<16x1xf32, #tpu.memory_space<vmem>>, vector<16x1xf32>
    %5 = vector.broadcast %4 : vector<16x1xf32> to vector<16x256xf32>
    %6 = arith.mulf %3, %5 : vector<16x256xf32>
    %c0_6 = arith.constant 0 : index
    %c0_7 = arith.constant 0 : index
    %7 = vector.load %arg4[%c0_6, %c0_7] : memref<16x1xf32, #tpu.memory_space<vmem>>, vector<16x1xf32>
    %8 = vector.broadcast %7 : vector<16x1xf32> to vector<16x256xf32>
    %9 = arith.addf %6, %8 : vector<16x256xf32>
    %cst_8 = arith.constant 0.000000e+00 : f32
    %10 = vector.broadcast %cst_8 : f32 to vector<16x256xf32>
    %11 = arith.maximumf %9, %10 : vector<16x256xf32>
    %12 = vector.extract_strided_slice %11 {offsets = [0, 0], sizes = [8, 256], strides = [1, 1]} : vector<16x256xf32> to vector<8x256xf32>
    %13 = vector.extract_strided_slice %11 {offsets = [8, 0], sizes = [8, 256], strides = [1, 1]} : vector<16x256xf32> to vector<8x256xf32>
    %14 = arith.addf %12, %13 : vector<8x256xf32>
    %cst_9 = arith.constant dense<0.000000e+00> : vector<8xf32>
    %15 = vector.multi_reduction <add>, %14, %cst_9 [1] : vector<8x256xf32> to vector<8xf32>
    %16 = vector.shape_cast %15 : vector<8xf32> to vector<8x1xf32>
    %cst_10 = arith.constant 2.560000e+02 : f32
    %17 = vector.broadcast %cst_10 : f32 to vector<8x1xf32>
    %18 = arith.divf %16, %17 : vector<8x1xf32>
    %c0_11 = arith.constant 0 : index
    %c0_12 = arith.constant 0 : index
    %19 = vector.load %arg5[%c0_11, %c0_12] : memref<4x8xf32, #tpu.memory_space<vmem>>, vector<4x8xf32>
    %cst_13 = arith.constant dense<0.000000e+00> : vector<4x1xf32>
    %20 = tpu.matmul %19, %18, %cst_13 {dimension_numbers = #tpu.dot_dimension_numbers<[1], [0], [0], [1], [0, 0, 1, 1], [], []>} : vector<4x8xf32>, vector<8x1xf32>, vector<4x1xf32> -> vector<4x1xf32>
    %c0_14 = arith.constant 0 : index
    %c0_15 = arith.constant 0 : index
    %21 = vector.load %arg6[%c0_14, %c0_15] : memref<4x1xf32, #tpu.memory_space<vmem>>, vector<4x1xf32>
    %22 = arith.addf %20, %21 : vector<4x1xf32>
    %c0_16 = arith.constant 0 : index
    %c0_17 = arith.constant 0 : index
    %23 = vector.load %arg7[%c0_16, %c0_17] : memref<16x4xf32, #tpu.memory_space<vmem>>, vector<16x4xf32>
    %cst_18 = arith.constant dense<0.000000e+00> : vector<16x1xf32>
    %24 = tpu.matmul %23, %22, %cst_18 {dimension_numbers = #tpu.dot_dimension_numbers<[1], [0], [0], [1], [0, 0, 1, 1], [], []>} : vector<16x4xf32>, vector<4x1xf32>, vector<16x1xf32> -> vector<16x1xf32>
    %25 = vector.extract_strided_slice %24 {offsets = [0, 0], sizes = [8, 1], strides = [1, 1]} : vector<16x1xf32> to vector<8x1xf32>
    %26 = vector.extract_strided_slice %24 {offsets = [8, 0], sizes = [8, 1], strides = [1, 1]} : vector<16x1xf32> to vector<8x1xf32>
    %27 = arith.maximumf %25, %26 : vector<8x1xf32>
    %28 = arith.subf %25, %27 : vector<8x1xf32>
    %29 = math.exp %28 : vector<8x1xf32>
    %30 = arith.subf %26, %27 : vector<8x1xf32>
    %31 = math.exp %30 : vector<8x1xf32>
    %32 = arith.addf %29, %31 : vector<8x1xf32>
    %33 = tpu.reciprocal %32 {approx = true} : vector<8x1xf32> -> vector<8x1xf32>
    %34 = arith.mulf %29, %33 : vector<8x1xf32>
    %35 = arith.mulf %31, %33 : vector<8x1xf32>
    %36 = tpu.concatenate %34, %35 in 0 : vector<8x1xf32>, vector<8x1xf32> -> vector<16x1xf32>
    %c0_19 = arith.constant 0 : index
    %c0_20 = arith.constant 0 : index
    %c0_21 = arith.constant 0 : index
    %37 = vector.load %arg9[%c0_19, %c0_20, %c0_21] : memref<1x16x1xf32, #tpu.memory_space<vmem>>, vector<1x16x1xf32>
    %38 = vector.shape_cast %37 : vector<1x16x1xf32> to vector<16x1xf32>
    %39 = vector.shape_cast %36 : vector<16x1xf32> to vector<1x16x1xf32>
    tpu.vector_store %arg9[%c0_19, %c0_20, %c0_21], %39 {strides = array<i32>} : memref<1x16x1xf32, #tpu.memory_space<vmem>>, vector<1x16x1xf32>,
    %40 = vector.extract_strided_slice %11 {offsets = [0, 0], sizes = [8, 256], strides = [1, 1]} : vector<16x256xf32> to vector<8x256xf32>
    %41 = vector.broadcast %34 : vector<8x1xf32> to vector<8x256xf32>
    %42 = arith.mulf %41, %40 : vector<8x256xf32>
    %43 = vector.extract_strided_slice %11 {offsets = [8, 0], sizes = [8, 256], strides = [1, 1]} : vector<16x256xf32> to vector<8x256xf32>
    %44 = vector.broadcast %35 : vector<8x1xf32> to vector<8x256xf32>
    %45 = arith.mulf %44, %43 : vector<8x256xf32>
    %46 = arith.addf %42, %45 : vector<8x256xf32>
    %c0_22 = arith.constant 0 : index
    %c0_23 = arith.constant 0 : index
    %c0_24 = arith.constant 0 : index
    %47 = vector.load %arg8[%c0_22, %c0_23, %c0_24] : memref<1x8x256xf32, #tpu.memory_space<vmem>>, vector<1x8x256xf32>
    %48 = vector.shape_cast %47 : vector<1x8x256xf32> to vector<8x256xf32>
    %49 = vector.shape_cast %46 : vector<8x256xf32> to vector<1x8x256xf32>
    tpu.vector_store %arg8[%c0_22, %c0_23, %c0_24], %49 {strides = array<i32>} : memref<1x8x256xf32, #tpu.memory_space<vmem>>, vector<1x8x256xf32>,
    return
  }
  func.func @transform_0(%arg0: i32) -> (i32, i32, i32) {
    %c0_i32 = arith.constant 0 : i32
    %c0_i32_0 = arith.constant 0 : i32
    %c0_i32_1 = arith.constant 0 : i32
    return %arg0, %c0_i32, %c0_i32_0 : i32, i32, i32
  }
  func.func @transform_1(%arg0: i32) -> (i32, i32) {
    %c0_i32 = arith.constant 0 : i32
    %c0_i32_0 = arith.constant 0 : i32
    %c0_i32_1 = arith.constant 0 : i32
    return %c0_i32, %c0_i32_0 : i32, i32
  }
  func.func @transform_2(%arg0: i32) -> (i32, i32) {
    %c0_i32 = arith.constant 0 : i32
    %c0_i32_0 = arith.constant 0 : i32
    %c0_i32_1 = arith.constant 0 : i32
    return %c0_i32, %c0_i32_0 : i32, i32
  }
  func.func @transform_3(%arg0: i32) -> (i32, i32) {
    %c0_i32 = arith.constant 0 : i32
    %c0_i32_0 = arith.constant 0 : i32
    %c0_i32_1 = arith.constant 0 : i32
    return %c0_i32, %c0_i32_0 : i32, i32
  }
  func.func @transform_4(%arg0: i32) -> (i32, i32) {
    %c0_i32 = arith.constant 0 : i32
    %c0_i32_0 = arith.constant 0 : i32
    %c0_i32_1 = arith.constant 0 : i32
    return %c0_i32, %c0_i32_0 : i32, i32
  }
  func.func @transform_5(%arg0: i32) -> (i32, i32) {
    %c0_i32 = arith.constant 0 : i32
    %c0_i32_0 = arith.constant 0 : i32
    %c0_i32_1 = arith.constant 0 : i32
    return %c0_i32, %c0_i32_0 : i32, i32
  }
  func.func @transform_6(%arg0: i32) -> (i32, i32) {
    %c0_i32 = arith.constant 0 : i32
    %c0_i32_0 = arith.constant 0 : i32
    %c0_i32_1 = arith.constant 0 : i32
    return %c0_i32, %c0_i32_0 : i32, i32
  }
  func.func @transform_7(%arg0: i32) -> (i32, i32, i32) {
    %c0_i32 = arith.constant 0 : i32
    %c0_i32_0 = arith.constant 0 : i32
    %c0_i32_1 = arith.constant 0 : i32
    return %arg0, %c0_i32, %c0_i32_0 : i32, i32, i32
  }
  func.func @transform_8(%arg0: i32) -> (i32, i32, i32) {
    %c0_i32 = arith.constant 0 : i32
    %c0_i32_0 = arith.constant 0 : i32
    %c0_i32_1 = arith.constant 0 : i32
    return %arg0, %c0_i32, %c0_i32_0 : i32, i32, i32
  }
}

</mosaic_0001>

<bundles_post_ra>
// kernel: tpu_custom_call.1
= control target key start
LH: loop header
LB: loop body
LE: loop exit
PB: predicated region body
PF: predicated region fallthrough
CT: control target
= control target key end

     0   :  { %14 = vsyncpa [#allocation3], 0  ;;  %s1312_s0 = inlined_call_operand.hbm [shape: f32[2,104,256], index: 0, kind: input, shape index: {}]   ;;  %s1313_s1 = inlined_call_operand.vmem [shape: f32[16,104], index: 1, kind: input, shape index: {}]   ;;  %s1314_s2 = inlined_call_operand.vmem [shape: f32[16,1], index: 2, kind: input, shape index: {}]   ;;  %s1315_s3 = inlined_call_operand.vmem [shape: f32[16,1], index: 3, kind: input, shape index: {}]   ;;  %s1316_s4 = inlined_call_operand.vmem [shape: f32[4,8], index: 4, kind: input, shape index: {}]   ;;  %s1317_s5 = inlined_call_operand.vmem [shape: f32[4,1], index: 5, kind: input, shape index: {}]   ;;  %s1318_s6 = inlined_call_operand.vmem [shape: f32[16,4], index: 6, kind: input, shape index: {}]   ;;  %s1319_s7 = inlined_call_operand.hbm [shape: f32[2,8,256], index: 7, kind: output, shape index: {0}]   ;;  %s1320_s8 = inlined_call_operand.vmem [shape: f32[2,16,1], index: 8, kind: output, shape index: {1}]  }
   0x1   :  { %16 = vsyncpa [#allocation3 + $0x1], 0 }
   0x2   :  { %17 = vsyncpa [#allocation4], 0 }
   0x3   :  { %19 = vsyncpa [#allocation4 + $0x1], 0  ;;  %s1078_s27 = smov 0   ;;  %s1080_s28 = smov 0  }
   0x4   :  { %s1082_s29 = smov 0   ;;  %s1084_s30 = smov 0  }
   0x5 LB: > { %s1099_s9 = sadd.s32 4294967295, %s1024_s30   ;;  %s806_s10 = sadd.s32 4294967294, %s1024_s30   ;;  %s1024_s30 = sphi %s1084_s30, %s1334_s30   ;;  %s1020_s29 = sphi %s1082_s29, %s1333_s29   ;;  %s1016_s28 = sphi %s1080_s28, %s1332_s28   ;;  %s1012_s27 = sphi %s1078_s27, %s1331_s27  }
   0x6   : > { %s1103_s11 = sadd.s32 1, %s1024_s30   ;;  %s32_s12 = sadd.s32 1, %s1020_s29 }
   0x7   : > { %s29_s13 = ssub.s32 %s1024_s30, %s1103_s11  ;;  %p39_p0 = scmp.ne.s32.totalorder %s1020_s29, %s1016_s28 }
   0x8   : > { %p30_p1 = scmp.eq.s32.totalorder %s29_s13, 0  ;;  %p40_p2 = scmp.eq.s32.totalorder %s1024_s30, 0 }
   0x9   : > { %p45_p3 = scmp.ne.s32.totalorder %s1016_s28, %s1012_s27  ;;  %p46_p4 = scmp.eq.s32.totalorder %s1099_s9, 0 }
   0xa   : > { %s1115_s14 = scalar_select %p30_p1, %s1020_s29, %s32_s12  }
   0xb   : > { %p41_p5 = por %p40_p2, %p39_p0  ;;  %p1117_p6 = por %p46_p4, %p45_p3 }
   0xc   : > { %1322 = sst [smem:[#allocation8_spill]] %s1115_s14  ;;  %p195_p7 = scmp.eq.s32.totalorder %s1099_s9, 1 }
   0xd   : > { %p201_p8 = scmp.eq.s32.totalorder %s806_s10, 1  ;;  %p881_p10 = scmp.lt.s32.totalorder %s1024_s30, 2 }
   0xe   : > { %p1124_p11 = por %p195_p7, %p39_p0  ;;  %s265_s18 = sand.u32 1, %s1020_s29  }
   0xf   : > { %p1128_p12 = por %p201_p8, %p45_p3  ;;  %s867_s19 = smul.u32 3328, %s1024_s30 }
  0x10   : > { %s1324_s16 = scalar_select %p1124_p11, 1, 0 }
  0x11   : > { %s1325_s17 = scalar_select %p1128_p12, 1, 0 }
  0x12   : > { %s866_s20 = smul.u32 208, %s265_s18  ;;  %s1137_s23 = scalar_lea.hbm %s1312_s0, %s867_s19 }
  0x13   : > { %p1139_p13 = pnand %p881_p10, %p41_p5  ;;  %s1145_s10 = scalar_lea.sflag [#allocation3], %s265_s18 }
  0x14   : > { %s269_s25 = scalar_lea.vmem [#allocation2], %s866_s20  ;;  %s928_s12 = scalar_lea.hbm %s1137_s23, 3328 }
  0x15   : > { %s276_s26 = sshll.u32 %s269_s25, 4  ;;  %p929_p0 = scmp.ne.s32.totalorder %s1137_s23, %s928_s12  ;;  %s1143_s26 = int_to_ptr.vmem [resolvable:$true] %s276_s26 }
  0x16   : > { %p930_p1 = pneg %p1139_p13  ;;  %s933_s21 = scalar_lea.hbm %s1312_s0, 6656 }
  0x17   : > { %p934_p4 = scmp.lt.u32.totalorder %s1137_s23, %s1312_s0  ;;  %p935_p5 = scmp.lt.u32.totalorder %s933_s21, %s928_s12 }
  0x18   : > { %p931_p2 = pnand %p930_p1, %p929_p0  ;;  %p937_p8 = scmp.lt.u32.totalorder %s928_s12, %s1137_s23 }
  0x19   : > { %p936_p7 = por %p935_p5, %p934_p4 }
  0x1a   : > { %p932_p3 = pneg %p931_p2 }
  0x1b   : > { %p938_p10 = por %p937_p8, %p936_p7 }
  0x1d   : > { %p939_p9 = pnand %p938_p10, %p932_p3 }
  0x1f   : > { %942 = shalt.err (!%p939_p9)
}
  0x20   : > { %s943_s18 = scalar_lea.vmem %s1143_s26, 3328  ;;  %s1026_s20 = smov [#allocation2]  }
  0x21   : > { %p944_p0 = scmp.ne.s32.totalorder %s1143_s26, %s943_s18  ;;  %s948_s25 = sshll.u32 %s1026_s20, 4  ;;  %s949_s25 = int_to_ptr.vmem [resolvable:$false] %s948_s25 }
  0x22   : > { %s950_s14 = scalar_lea.vmem %s949_s25, 6656  ;;  %p951_p11 = scmp.lt.s32.totalorder %s1143_s26, %s949_s25 }
  0x23   : > { %p946_p2 = pnand %p944_p0, %p930_p1  ;;  %p952_p4 = scmp.lt.s32.totalorder %s950_s14, %s943_s18 }
  0x25   : > { %p947_p12 = pneg %p946_p2  ;;  %p953_p5 = por %p952_p4, %p951_p11 }
  0x27   : > { %p954_p7 = pnand %p953_p5, %p947_p12 }
  0x29   : > { %957 = shalt.err (!%p954_p7)
}
  0x2a   : > { %s1027_s12 = smov 256   ;;  %s1028_s13 = smov 16  }
  0x2b   : > { %876 = dma.hbm_to_vmem [thread:$0]  (!%p1139_p13), %s1137_s23, 3328, %s1143_s26, %s1145_s10, %s1027_s12, %s1027_s12, %s1028_s13  }
  0x2c   : > { %p810_p9 = scmp.ge.s32.totalorder %s1024_s30, 1  ;;  %p284_p1 = scmp.lt.s32.totalorder %s1024_s30, 3 }
  0x2e   : > { %p285_p3 = pnand %p810_p9, %p284_p1 }
  0x2f   : > { %s1176_s19 = sand.u32 (!%p285_p3), 1, %s1016_s28  }
  0x30   : > { %288 = sbr.rel (%p285_p3) target bundleno = 1069 (0x42d), region = 48  ;;  %s291_s22 = scalar_lea.sflag (!%p285_p3), [#allocation3], %s1176_s19 }
  0x31   : > { %s868_s21 = smul.u32 (!%p285_p3), 208, %s1176_s19 }
  0x33   : > { %s1180_s18 = scalar_lea.vmem (!%p285_p3), [#allocation2], %s868_s21 }
  0x37   : > { %1003 = dma.done.wait (%p1117_p6), %s291_s22, 3328  }
  0x38   : > { %1005 = vsyncadd (%p1117_p6), %s291_s22, 4294963968  ;;  %v1029_v0 = vmov 0.0   ;;  %v1030_v1 = vmov 0   ;;  %v340_v2 = vld [vmem:[%s1180_s18 + $0x8] sm:$0xff]  ;;  %v342_v3 = vld [vmem:[%s1180_s18 + $0x18] sm:$0xff]  ;;  %vm365_vm0 = vcmask 850944  }
  0x39   : > { %436 = vmatprep.mubr.f32.mxu0 %v1029_v0  ;;  %920 = vset.pattern.permute.xlu0 %v1030_v1  ;;  %v339_v4 = vld [vmem:[%s1180_s18] sm:$0xff]  ;;  %v842_v5 = vpack.c.bf16 %v342_v3, %v340_v2  ;;  %v341_v6 = vld [vmem:[%s1180_s18 + $0x10] sm:$0xff]  ;;  %v344_v7 = vld [vmem:[%s1180_s18 + $0x28] sm:$0xff]  ;;  %vm1031_vm1 = vmmov 0   ;;  %vm494_vm2 = vcmask 64512   ;;  %vm570_vm3 = vcmask 31744  }
  0x3a   : > { %921 = vset.pattern.permute.xlu1 %v1030_v1  ;;  %832 = vmatprep.subr.mxu1 %v1029_v0  ;;  %v346_v8 = vld [vmem:[%s1180_s18 + $0x38] sm:$0xff]  ;;  %v844_v9 = vpack.c.bf16 %v341_v6, %v339_v4  ;;  %v343_v11 = vld [vmem:[%s1180_s18 + $0x20] sm:$0xff]  ;;  %v345_v12 = vld [vmem:[%s1180_s18 + $0x30] sm:$0xff]  ;;  %vm577_vm4 = vcmask 1043456   ;;  %p332_p6 = scmp.lt.s32.totalorder %s1099_s9, 1  ;;  %vm667_vm5 = vcmask 7168  }
  0x3b   : > { %v846_v10 = vpack.c.bf16 %v346_v8, %v344_v7  ;;  %v348_v13 = vld [vmem:[%s1180_s18 + $0x48] sm:$0xff]  ;;  %843 = vmatprep.subr.bf16.mxu0 %v842_v5  ;;  %v350_v14 = vld [vmem:[%s1180_s18 + $0x58] sm:$0xff]  ;;  %v848_v15 = vpack.c.bf16 %v345_v12, %v343_v11  ;;  %v347_v17 = vld [vmem:[%s1180_s18 + $0x40] sm:$0xff]  ;;  %834 = vmatprep.mubr.msk.f32.mxu1 %vm1031_vm1, %v1029_v0  ;;  %s826_s15 = sshll.u32 %s1099_s9, 8  ;;  %p1327_p12 = scmp.ne.s32.totalorder %s1324_s16, 0 }
  0x3c   : > { %845 = vmatpush1.bf16.msra.mxu0 %v844_v9  ;;  %v850_v16 = vpack.c.bf16 %v350_v14, %v348_v13  ;;  %v349_v18 = vld [vmem:[%s1180_s18 + $0x50] sm:$0xff]  ;;  %v352_v19 = vld [vmem:[%s1180_s18 + $0x68] sm:$0xff]  ;;  %v354_v20 = vld [vmem:[%s1180_s18 + $0x78] sm:$0xff]  ;;  %s333_s14 = scalar_select %p332_p6, %s1099_s9, 1 }
  0x3d   : > { %847 = vmatprep.subr.bf16.mxu0 %v846_v10  ;;  %v852_v21 = vpack.c.bf16 %v349_v18, %v347_v17  ;;  %v351_v22 = vld [vmem:[%s1180_s18 + $0x60] sm:$0xff]  ;;  %v854_v23 = vpack.c.bf16 %v354_v20, %v352_v19  ;;  %v353_v24 = vld [vmem:[%s1180_s18 + $0x70] sm:$0xff]  ;;  %v356_v27 = vld [vmem:[%s1180_s18 + $0x88] sm:$0xff]  ;;  %s1268_s20 = scalar_lea.hbm %s1319_s7, %s826_s15  ;;  %s689_s9 = scalar_lea.sflag [#allocation4], %s1176_s19 }
  0x3e   : > { %v449_v25 = vld [vmem:[%s1314_s2] sm:$0xff]  ;;  %v358_v28 = vld [vmem:[%s1180_s18 + $0x98] sm:$0xff]  ;;  %v856_v31 = vpack.c.bf16 %v353_v24, %v351_v22  ;;  %v360_v35 = vld [vmem:[%s1180_s18 + $0xa8] sm:$0xff]  ;;  %s825_s12 = sshll.u32 %s333_s14, 4  ;;  %s1032_s14 = smov [#allocation5]  }
  0x3f   : > { %v465_v26 = vld [vmem:[%s1315_s3] sm:$0xff]  ;;  %453 = vperm.xlu0 %920, %v449_v25   ;;  %v450_v29 = vld [vmem:[%s1314_s2 + $0x8] sm:$0xff]  ;;  %v858_v32 = vpack.c.bf16 %v358_v28, %v356_v27  ;;  %s336_s22 = scalar_lea.vmem %s1320_s8, %s825_s12  ;;  %s962_s12 = sshll.u32 %s1032_s14, 4  ;;  %s963_s12 = int_to_ptr.vmem [resolvable:$false] %s962_s12 }
  0x40   : > { %849 = vmatpush1.bf16.msra.mxu0 %v848_v15  ;;  %469 = vperm.xlu1 %921, %v465_v26   ;;  %v466_v30 = vld [vmem:[%s1315_s3 + $0x8] sm:$0xff]  ;;  %v355_v33 = vld [vmem:[%s1180_s18 + $0x80] sm:$0xff]  ;;  %v357_v34 = vld [vmem:[%s1180_s18 + $0x90] sm:$0xff]  ;;  %s964_s13 = scalar_lea.vmem %s963_s12, 512 }
  0x41   : > { %851 = vmatprep.subr.bf16.mxu0 %v850_v16  ;;  %v362_v36 = vld [vmem:[%s1180_s18 + $0xb8] sm:$0xff]  ;;  %v860_v37 = vpack.c.bf16 %v357_v34, %v355_v33  ;;  %v359_v39 = vld [vmem:[%s1180_s18 + $0xa0] sm:$0xff]  ;;  %v361_v40 = vld [vmem:[%s1180_s18 + $0xb0] sm:$0xff] }
  0x42   : > { %v862_v38 = vpack.c.bf16 %v362_v36, %v360_v35  ;;  %v864_v41 = vpack.c.bf16 %v361_v40, %v359_v39  ;;  %v364_v42 = vld [vmem:[%s1180_s18 + $0xc8] sm:$0xff]  ;;  %v363_v43 = vld [vmem:[%s1180_s18 + $0xc0] sm:$0xff]  ;;  %s811_s18 = sshll.u32 %s1176_s19, 4 }
  0x43   : > { %458 = vperm.xlu0 %920, %v450_v29   ;;  %v337_v44 = vld [vmem:[%s1313_s1] sm:$0xff]  ;;  %v338_v45 = vld [vmem:[%s1313_s1 + $0x8] sm:$0xff]  ;;  %s324_s23 = scalar_lea.vmem [#allocation5], %s811_s18 }
  0x44   : > { %853 = vmatpush1.bf16.msra.mxu0 %v852_v21  ;;  %474 = vperm.xlu1 %921, %v466_v30   ;;  %v492_v8 = vld [vmem:[%s1316_s4] sm:$0xf]  ;;  %v569_v13 = vld [vmem:[%s1318_s6 + $0x8] sm:$0xff]  ;;  %s708_s24 = sshll.u32 %s324_s23, 4  ;;  %s1270_s24 = int_to_ptr.vmem [resolvable:$true] %s708_s24 }
  0x45   : > { %855 = vmatprep.subr.bf16.mxu0 %v854_v23  ;;  %v568_v9 = vld [vmem:[%s1318_s6] sm:$0xff]  ;;  %s958_s25 = scalar_lea.vmem %s1270_s24, 256  ;;  %p965_p10 = scmp.lt.s32.totalorder %s1270_s24, %s963_s12 }
  0x46   : > { %v493_v10 = vld [vmem:[%s1317_s5] sm:$0xf]  ;;  %p959_p11 = scmp.ne.s32.totalorder %s1270_s24, %s958_s25  ;;  %p966_p0 = scmp.lt.s32.totalorder %s964_s13, %s958_s25 }
  0x48   : > { %857 = vmatpush1.bf16.msra.mxu0 %v856_v31  ;;  %p960_p13 = pnand %p959_p11, %p1327_p12  ;;  %p967_p2 = por %p966_p0, %p965_p10 }
  0x49   : > { %859 = vmatprep.subr.bf16.mxu0 %v858_v32 }
  0x4a   : > { %p961_p8 = pneg %p960_p13 }
  0x4c   : > { %861 = vmatpush1.bf16.msra.mxu0 %v860_v37  ;;  %p968_p4 = pnand %p967_p2, %p961_p8 }
  0x4d   : > { %863 = vmatprep.subr.bf16.mxu0 %v862_v38 }
  0x50   : > { %865 = vmatpush1.bf16.msra.mxu0 %v864_v41 }
  0x51   : > { %396 = vmatprep.subr.mxu0 %v364_v42 }
  0x54   : > { %397 = vmatpush1.msra.mxu0 %v363_v43 }
  0x55   : > { %814 = vmatmul.mubr.msk.f32.vlgmr.msra.gmra.mrb[0].mxu0 %vm365_vm0, %v337_v44 }
  0x56   : > { %442 = vmatprep.mubr.f32.mxu0 %v1029_v0 }
  0x59   : > { %815 = vmatmul.mubr.msk.f32.gmra.mrb[2].mxu0 %vm365_vm0, %v338_v45 }
  0xbe   : > { %v454_v46 = vpop.permute.xlu0 %453 }
  0xbf   : > { %v470_v47 = vpop.permute.xlu1 %469 }
  0xc2   : > { %v459_v52 = vpop.permute.xlu0 %458 }
  0xc3   : > { %v475_v58 = vpop.permute.xlu1 %474 }
 0x128   : > { %v438_v48 = vpop.f32.mrb[0].mxu0 }
 0x129   : > { %v461_v49 = vmul.f32 %v454_v46, %v438_v48  ;;  %v440_v50 = vpop.f32.mrb[1].mxu0 }
 0x12a   : > { %v462_v51 = vmul.f32 %v454_v46, %v440_v50 }
 0x12b   : > { %v1233_v54 = vadd.f32 %v470_v47, %v461_v49 }
 0x12c   : > { %v444_v53 = vpop.f32.mrb[2].mxu0  ;;  %v1235_v57 = vadd.f32 %v470_v47, %v462_v51 }
 0x12d   : > { %v463_v55 = vmul.f32 %v459_v52, %v444_v53  ;;  %v446_v56 = vpop.f32.mrb[3].mxu0  ;;  %v481_v62 = vmax.f32 %v1233_v54, 0.0 }
 0x12e   : > { %v464_v59 = vmul.f32 %v459_v52, %v446_v56  ;;  %v482_v1 = vmax.f32 %v1235_v57, 0.0 }
 0x12f   : > { %v1237_v60 = vadd.f32 %v475_v58, %v463_v55 }
 0x130   : > { %v1239_v61 = vadd.f32 %v475_v58, %v464_v59 }
 0x131   : > { %v483_v63 = vmax.f32 %v1237_v60, 0.0 }
 0x132   : > { %v484_v2 = vmax.f32 %v1239_v61, 0.0 }
 0x133   : > { %v485_v3 = vadd.f32 %v483_v63, %v481_v62 }
 0x134   : > { %v486_v4 = vadd.f32 %v484_v2, %v482_v1 }
 0x136   : > { %v487_v5 = vadd.f32 %v486_v4, %v485_v3 }
 0x138   : > { %488 = vadd.xlane.f32.xlu0 %v487_v5 }
 0x1c5   : > { %v489_v6 = vpop.xlane.xlu0 %488 }
 0x1c6   : > { %v491_v7 = vmul.f32 0.00390625, %v489_v6 }
 0x1c8   : > { %833 = vmatpush3.msra.mxu1 %v491_v7 }
 0x1c9   : > { %835 = vmatmul.mubr.msk.f32.vlgmr.msra.gmra.mrb[0].mxu1 %vm494_vm2, %v492_v8 }
 0x1ca   : > { %839 = vmatprep.mubr.msk.f32.mxu1 %vm570_vm3, %v568_v9 }
 0x29c   : > { %v564_v0 = vpop.f32.mrb[0].mxu1 }
 0x29d   : > { %v565_v11 = vadd.f32 %v564_v0, %v493_v10  ;;  %v836_v12 = vpop.f32.mrb[1].mxu1 }
 0x29f   : > { %837 = vmatprep.subr.msk.mxu1 %vm577_vm4, %v565_v11 }
 0x2a0   : > { %838 = vmatpush3.msk.msra.mxu1 %vm577_vm4, %v565_v11 }
 0x2a1   : > { %840 = vmatmul.mubr.msk.f32.vlgmr.msra.gmra.mrb[2].mxu1 %vm570_vm3, %v569_v13 }
 0x374   : > { %v841_v14 = vpop.f32.mrb[2].mxu1 }
 0x375   : > { %v647_v15 = vpop.f32.mrb[3].mxu1 }
 0x376   : > { %v656_v16 = vmax.f32 %v647_v15, %v841_v14 }
 0x378   : > { %v657_v17 = vsub.f32 %v647_v15, %v656_v16  ;;  %v660_v18 = vsub.f32 %v841_v14, %v656_v16 }
 0x37a   : > { %v658_v19 = vmul.f32 1.442695, %v657_v17  ;;  %v661_v20 = vmul.f32 1.442695, %v660_v18 }
 0x37c   : > { %922 = vpow2.f32 %v658_v19 }
 0x37d   : > { %924 = vpow2.f32 %v661_v20 }
 0x386   : > { %v923_v21 = vpop.eup %922 }
 0x387   : > { %v925_v22 = vpop.eup %924 }
 0x388   : > { %v663_v23 = vadd.f32 %v925_v22, %v923_v21 }
 0x38a   : > { %926 = vrcp.f32 %v663_v23 }
 0x394   : > { %v927_v24 = vpop.eup %926 }
 0x395   : > { %v665_v25 = vmul.f32 %v927_v24, %v923_v21  ;;  %v666_v26 = vmul.f32 %v927_v24, %v925_v22 }
 0x397   : > { %672 = vperm.xlu1 %921, %v665_v25   ;;  %668 = vst.msk [vmem:[%s336_s22] sm:$0xff] %vm667_vm5, %v665_v25  ;;  %669 = vst.msk [vmem:[%s336_s22 + $0x8] sm:$0xff] %vm667_vm5, %v666_v26 }
 0x39b   : > { %679 = vperm.xlu1 %921, %v666_v26  }
 0x416   : > { %v673_v27 = vpop.permute.xlu1 %672 }
 0x417   : > { %v675_v29 = vmul.f32 %v673_v27, %v481_v62  ;;  %v676_v30 = vmul.f32 %v673_v27, %v482_v1 }
 0x41a   : > { %v680_v28 = vpop.permute.xlu1 %679 }
 0x41b   : > { %v682_v31 = vmul.f32 %v680_v28, %v483_v63  ;;  %v683_v32 = vmul.f32 %v680_v28, %v484_v2 }
 0x41d   : > { %v684_v33 = vadd.f32 %v682_v31, %v675_v29  ;;  %v685_v34 = vadd.f32 %v683_v32, %v676_v30 }
 0x41f   : > { %686 = vst [vmem:[%s324_s23] sm:$0xff] %v684_v33  ;;  %687 = vst [vmem:[%s324_s23 + $0x8] sm:$0xff] %v685_v34 }
 0x420   : > { %971 = shalt.err (!%p968_p4)
}
 0x421   : > { %s972_s19 = scalar_lea.hbm %s1268_s20, 256  ;;  %s976_s18 = scalar_lea.hbm %s1319_s7, 512 }
 0x422   : > { %p973_p5 = scmp.ne.s32.totalorder %s1268_s20, %s972_s19  ;;  %p977_p1 = scmp.lt.u32.totalorder %s1268_s20, %s1319_s7 }
 0x423   : > { %p978_p3 = scmp.lt.u32.totalorder %s976_s18, %s972_s19  ;;  %p980_p11 = scmp.lt.u32.totalorder %s972_s19, %s1268_s20 }
 0x424   : > { %p974_p7 = pnand %p973_p5, %p1327_p12 }
 0x425   : > { %p979_p6 = por %p978_p3, %p977_p1 }
 0x426   : > { %p975_p9 = pneg %p974_p7 }
 0x427   : > { %p981_p13 = por %p980_p11, %p979_p6 }
 0x429   : > { %p982_p8 = pnand %p981_p13, %p975_p9 }
 0x42b   : > { %985 = shalt.err (!%p982_p8)
}
 0x42c   : > { %871 = dma.vmem_to_hbm [thread:$0]  (%p1327_p12), %s1270_s24, 256, %s1268_s20, %s689_s9  }
 0x42d PF: > { %s723_s26 = sand.u32 1, %s1012_s27   ;;  %p1328_p10 = scmp.ne.s32.totalorder %s1325_s17, 0 }
 0x42e   : > { %p1329_p0 = scmp.ge.s32.totalorder %s1024_s30, 2  ;;  %s724_s10 = scalar_lea.sflag [#allocation4], %s723_s26 }
 0x430   : > { %p878_p2 = pnand %p1329_p0, %p1328_p10 }
 0x432   : > { %1007 = dma.done.wait (!%p878_p2), %s724_s10, 256  }
 0x433   : > { %1009 = vsyncadd (!%p878_p2), %s724_s10, 4294967040  ;;  %s1330_s25 = sld [smem:[#allocation8_spill]]  ;;  %p22_p4 = scmp.ge.s32.totalorder %s1103_s11, 4  }
 0x434   : > { %s1331_s27 = smov %s1016_s28  ;;  %s1332_s28 = smov %s1020_s29 }
 0x435   : > { %s1334_s30 = smov %s1103_s11  ;;  %24 = sbr.rel (!%p22_p4) target bundleno = 5 (0x5), region = 105 }
 0x439   : > { %s1333_s29 = smov %s1330_s25 }
 0x43c   :  { %737 = vsyncpa [#allocation3], 1 }
 0x43d   :  { %739 = vsyncpa [#allocation3 + $0x1], 1 }
 0x43e   :  { %740 = vsyncpa [#allocation4], 1 }
 0x43f   :  { %742 = vsyncpa [#allocation4 + $0x1], 1 }

</bundles_post_ra>
